<compile_context>
chip_gen: v5e
topology: v5e:2x2
jax: 0.10.0
libtpu: 0.0.40
codegen_flags: <defaults>
</compile_context>

<pallas_src>
import jax
import jax.numpy as jnp
from jax.experimental import pallas as pl
from jax.experimental.pallas import tpu as pltpu


def _identity_kernel(x_ref, o_ref):
    # DummyTransformerBlock.forward(x) == x  -> straight copy of the tile.
    o_ref[...] = x_ref[...]


class DummyTransformerBlockPallas:
    """Pallas equivalent of the PyTorch DummyTransformerBlock (an identity op)."""

    def __init__(self, cfg=None):
        # The PyTorch module stores nothing and has no parameters.
        self.cfg = cfg

    def __call__(self, x):
        orig_shape = x.shape
        total = 1
        for d in orig_shape:
            total *= int(d)
        itemsize = jnp.dtype(x.dtype).itemsize

        # --- Lane-dense relayout -------------------------------------------
        # Fold all dims into a (rows, width) slab with width a multiple of 128
        # so loads/stores use full 128-lane vectors.
        width = None
        for w in (4096, 2048, 1024, 512, 256, 128):
            if total % w == 0:
                width = w
                break
        if width is None:
            # TODO(synk): element count not a multiple of 128 — keep the
            # original last dim (full-extent lane block is legal, just not
            # lane-dense).
            width = int(orig_shape[-1])
        rows = total // width
        x2d = x.reshape(rows, width)

        # --- Block sizing ----------------------------------------------------
        # Sublane pack granularity: 8 (f32), 16 (bf16/f16), 32 (int8/fp8).
        pack = max(8, 32 // itemsize)
        # Target ~1 MiB per block: double-buffered in+out => ~4 MiB of VMEM,
        # safe on v5e/v6e (128 MiB) and v7x (64 MiB, 32 MiB default scoped).
        target_block_bytes = 1 << 20
        tile_rows = (target_block_bytes // (width * itemsize)) // pack * pack
        tile_rows = max(pack, tile_rows)
        if tile_rows >= rows:
            tile_rows = rows  # full-extent row block is always layout-legal

        grid = (pl.cdiv(rows, tile_rows),)  # ragged last block handled by Pallas

        out2d = pl.pallas_call(
            _identity_kernel,
            out_shape=jax.ShapeDtypeStruct((rows, width), x.dtype),
            grid_spec=pltpu.PrefetchScalarGridSpec(
                num_scalar_prefetch=0,
                grid=grid,
                in_specs=[pl.BlockSpec((tile_rows, width), lambda i: (i, 0))],
                out_specs=pl.BlockSpec((tile_rows, width), lambda i: (i, 0)),
            ),
            compiler_params=pltpu.CompilerParams(
                dimension_semantics=("parallel",),
                vmem_limit_bytes=32 * 1024 * 1024,
            ),
            cost_estimate=pl.CostEstimate(
                flops=0,
                transcendentals=0,
                bytes_accessed=2 * total * itemsize,
            ),
            # Alias output 0 onto input 0: no second HBM allocation; becomes a
            # true in-place pass when the caller donates the input buffer.
            input_output_aliases={0: 0},
        )(x2d)

        return out2d.reshape(orig_shape)


if __name__ == "__main__":
    key = jax.random.PRNGKey(0)

    # Small shape implied by the module's use inside a toy LLM.
    batch, seq, hidden = 2, 8, 32
    x = jax.random.normal(key, (batch, seq, hidden), dtype=jnp.float32)

    block = DummyTransformerBlockPallas(cfg=None)
    y = block(x)
    y = jax.block_until_ready(y)

    assert y.shape == x.shape
    assert y.dtype == x.dtype
    assert bool(jnp.all(y == x))

    # Larger activation to exercise the multi-block, lane-dense tiled path.
    x_big = jax.random.normal(jax.random.PRNGKey(1), (8, 512, 1024), dtype=jnp.float32)
    y_big = jax.block_until_ready(block(x_big))
    assert y_big.shape == x_big.shape
    assert bool(jnp.all(y_big == x_big))

    print("KERNEL_OK")
</pallas_src>

<mosaic_0001>
module attributes {stable_mosaic.version = 11 : i64} {
  func.func @_identity_kernel(%arg0: i32, %arg1: memref<1x512xf32, #tpu.memory_space<vmem>>, %arg2: memref<1x512xf32, #tpu.memory_space<vmem>>) attributes {dimension_semantics = [#tpu.dimension_semantics<parallel>], iteration_bounds = array<i64: 1>, scalar_prefetch = 0 : i64, scratch_operands = 0 : i64, tpu.core_type = #tpu.core_type<tc>, window_params = [{transform_indices = @transform_0, window_bounds = array<i64: 1, 512>}, {transform_indices = @transform_1, window_bounds = array<i64: 1, 512>}]} {
    %c0 = arith.constant 0 : index
    %c0_0 = arith.constant 0 : index
    %0 = vector.load %arg1[%c0, %c0_0] : memref<1x512xf32, #tpu.memory_space<vmem>>, vector<1x512xf32>
    %c0_1 = arith.constant 0 : index
    %c0_2 = arith.constant 0 : index
    %1 = vector.load %arg2[%c0_1, %c0_2] : memref<1x512xf32, #tpu.memory_space<vmem>>, vector<1x512xf32>
    tpu.vector_store %arg2[%c0_1, %c0_2], %0 {strides = array<i32>} : memref<1x512xf32, #tpu.memory_space<vmem>>, vector<1x512xf32>,
    return
  }
  func.func @transform_0(%arg0: i32) -> (i32, i32) {
    %c0_i32 = arith.constant 0 : i32
    %c0_i32_0 = arith.constant 0 : i32
    return %arg0, %c0_i32 : i32, i32
  }
  func.func @transform_1(%arg0: i32) -> (i32, i32) {
    %c0_i32 = arith.constant 0 : i32
    %c0_i32_0 = arith.constant 0 : i32
    return %arg0, %c0_i32 : i32, i32
  }
}

</mosaic_0001>

<bundles_post_ra>
// kernel: tpu_custom_call.1
= control target key start
LH: loop header
LB: loop body
LE: loop exit
PB: predicated region body
PF: predicated region fallthrough
CT: control target
= control target key end

     0   :  { %6 = vsyncpa [#allocation3], 0  ;;  %s118_s0 = inlined_call_operand.hbm [shape: f32[1,512], index: 0, kind: input, shape index: {}, may-alias: {0,1}]   ;;  %s119_s1 = inlined_call_operand.hbm [shape: f32[1,512], index: 1, kind: output, shape index: {}, may-alias: {0,1}]  }
   0x1   :  { %7 = vsyncpa [#allocation4], 0  ;;  %s13_s8 = sshll.u32 %s118_s0, 4  ;;  %s100_s9 = smov [#allocation2]   ;;  %s14_s8 = int_to_ptr.hbm [resolvable:$true] %s13_s8 }
   0x2   :  { %s15_s10 = sshll.u32 %s100_s9, 4  ;;  %s16_s10 = int_to_ptr.vmem [resolvable:$true] %s15_s10 }
   0x3   :  { %18 = dma.hbm_to_vmem [thread:$0]  %s14_s8, 64, %s16_s10, [#allocation3]  }
   0x4   :  { %96 = dma.done.wait [#allocation3], 64  }
   0x5   :  { %97 = vsyncadd [#allocation3], 4294967232  ;;  %v24_v0 = vlaneseq  ;;  %s101_s11 = smov [#allocation5]   ;;  %s36_s15 = sshll.u32 %s119_s1, 4  ;;  %v23_v1 = vld [vmem:[#allocation2] sm:$0xf]  ;;  %s37_s15 = int_to_ptr.hbm [resolvable:$true] %s36_s15 }
   0x6   :  { %s34_s12 = sshll.u32 %s101_s11, 4  ;;  %s35_s12 = int_to_ptr.vmem [resolvable:$true] %s34_s12 }
   0x7   :  { %vm26_vm0 = vcmp.lt.s32.totalorder %v24_v0, 512 }
   0x8   :  { %28 = vst.msk [vmem:[#allocation5] sm:$0xf] %vm26_vm0, %v23_v1 }
   0x9   :  { %39 = dma.vmem_to_hbm [thread:$0]  %s35_s12, 64, %s37_s15, [#allocation4]  }
   0xa   :  { %98 = dma.done.wait [#allocation4], 64  }
   0xb   :  { %99 = vsyncadd [#allocation4], 4294967232 }
   0xc   :  { %44 = vsyncpa [#allocation3], 1 }
   0xd   :  { %45 = vsyncpa [#allocation4], 1 }

</bundles_post_ra>
